<compile_context>
chip_gen: v7x
topology: tpu7x:2x2x1
jax: 0.10.0
libtpu: 0.0.40
codegen_flags: <defaults>
</compile_context>

<pallas_src>
import functools

import jax
import jax.numpy as jnp
from jax.experimental import pallas as pl
from jax.experimental.pallas import tpu as pltpu


def _round_up(x: int, m: int) -> int:
    return ((x + m - 1) // m) * m


def _pick_tile(dim_padded: int, unit: int, max_tile: int) -> int:
    """Largest multiple of `unit` that divides `dim_padded` and is <= max_tile."""
    best = unit
    t = unit
    limit = min(dim_padded, max_tile)
    while t <= limit:
        if dim_padded % t == 0:
            best = t
        t += unit
    return best


# ---------------------------------------------------------------------------
# Kernels
# ---------------------------------------------------------------------------

def _linear_single_block_kernel(x_ref, w_ref, b_ref, o_ref):
    # Whole problem in one VMEM block: y = x @ wT + b.
    o_ref[...] = (
        jnp.dot(x_ref[...], w_ref[...], preferred_element_type=jnp.float32)
        + b_ref[...]
    ).astype(o_ref.dtype)


def _linear_tiled_kernel(x_ref, w_ref, b_ref, o_ref):
    # x_ref: (tm, tk)  w_ref: (tk, tn)  b_ref: (1, tn)  o_ref: (tm, tn) f32
    # Output block is resident across k (its index_map ignores k), so we
    # accumulate directly into it: init with bias at k == 0, then += dot.
    k = pl.program_id(2)

    @pl.when(k == 0)
    def _init():
        o_ref[...] = jnp.broadcast_to(b_ref[...], o_ref.shape)

    o_ref[...] += jnp.dot(
        x_ref[...], w_ref[...], preferred_element_type=jnp.float32
    )


# ---------------------------------------------------------------------------
# One-time parameter prep (hoisted out of the per-call hot path)
# ---------------------------------------------------------------------------

def prepare_single_layer_params(weight, bias, *, compute_dtype=jnp.float32):
    """Cache the MXU-native weight layout once at parameter-setup time.

    weight: (D_out, D_in)  -- PyTorch nn.Linear layout
    bias:   (D_out,)
    Returns:
      wt_p: (K_pad, N_pad) = weight.T zero-padded to 128-multiples, compute_dtype
      b_p:  (1, N_pad)     = bias zero-padded, float32
    """
    d_out, d_in = weight.shape
    k_pad = _round_up(d_in, 128)
    n_pad = _round_up(d_out, 128)
    wt = weight.T.astype(compute_dtype)                      # (D_in, D_out)
    wt_p = jnp.pad(wt, ((0, k_pad - d_in), (0, n_pad - d_out)))
    b_p = jnp.pad(
        bias.astype(jnp.float32).reshape(1, d_out), ((0, 0), (0, n_pad - d_out))
    )
    return wt_p, b_p


# ---------------------------------------------------------------------------
# Forward
# ---------------------------------------------------------------------------

@functools.partial(jax.jit, static_argnames=("d_out",))
def single_layer_forward(x, wt_p, b_p, *, d_out):
    """y = x @ W.T + b with W pre-transposed/padded by prepare_single_layer_params."""
    B, d_in = x.shape
    K_pad, N_pad = wt_p.shape
    assert b_p.shape == (1, N_pad)
    assert d_in <= K_pad and d_out <= N_pad
    M_pad = _round_up(B, 8)

    # Per-call input prep is x-sized only (weight work was hoisted to prep).
    x_p = x.astype(wt_p.dtype)
    if (M_pad != B) or (K_pad != d_in):
        x_p = jnp.pad(x_p, ((0, M_pad - B), (0, K_pad - d_in)))

    itemsize = jnp.dtype(wt_p.dtype).itemsize
    footprint = (M_pad * K_pad + K_pad * N_pad) * itemsize + M_pad * N_pad * 4

    if footprint <= (4 << 20):
        # ---------------- Fast path: single block, no grid / scratch ----------
        out_p = pl.pallas_call(
            _linear_single_block_kernel,
            out_shape=jax.ShapeDtypeStruct((M_pad, N_pad), jnp.float32),
            compiler_params=pltpu.CompilerParams(vmem_limit_bytes=32 << 20),
        )(x_p, wt_p, b_p)
    else:
        # ---------------- Tiled path: (M, N, K) grid, K innermost -------------
        tm = _pick_tile(M_pad, 8, 512)
        tn = _pick_tile(N_pad, 128, 512)
        tk = _pick_tile(K_pad, 128, 1024)

        # v7x has 2 TensorCores sharded over the "parallel" axes: make sure the
        # parallel part of the grid has at least 2 blocks when possible.
        if (M_pad // tm) * (N_pad // tn) == 1:
            if N_pad >= 256:
                tn = _pick_tile(N_pad, 128, N_pad // 2)
            elif M_pad >= 16:
                tm = _pick_tile(M_pad, 8, M_pad // 2)

        grid = (M_pad // tm, N_pad // tn, K_pad // tk)

        flops = 2 * M_pad * K_pad * N_pad
        # Count revisits: x is re-streamed per N tile, wT per M tile.
        bytes_accessed = (
            x_p.size * x_p.dtype.itemsize * grid[1]
            + wt_p.size * itemsize * grid[0]
            + b_p.size * 4
            + M_pad * N_pad * 4
        )

        out_p = pl.pallas_call(
            _linear_tiled_kernel,
            out_shape=jax.ShapeDtypeStruct((M_pad, N_pad), jnp.float32),
            grid_spec=pltpu.PrefetchScalarGridSpec(
                num_scalar_prefetch=0,
                grid=grid,
                in_specs=[
                    pl.BlockSpec((tm, tk), lambda i, j, k: (i, k)),   # x
                    pl.BlockSpec((tk, tn), lambda i, j, k: (k, j)),   # wT
                    pl.BlockSpec((1, tn), lambda i, j, k: (0, j)),    # bias
                ],
                out_specs=pl.BlockSpec((tm, tn), lambda i, j, k: (i, j)),
            ),
            compiler_params=pltpu.CompilerParams(
                dimension_semantics=("parallel", "parallel", "arbitrary"),
                vmem_limit_bytes=48 << 20,  # fits v7x's 64 MiB VMEM with headroom
            ),
            cost_estimate=pl.CostEstimate(
                flops=flops, transcendentals=0, bytes_accessed=bytes_accessed
            ),
        )(x_p, wt_p, b_p)

    # Slice off the (<=8 / <=128) alignment padding.
    return out_p[:B, :d_out]


if __name__ == "__main__":
    # --- Small shapes implied by the module (exercises the fast path) -------
    B, D_in, D_out = 8, 32, 16

    key = jax.random.PRNGKey(0)
    kx, kw, kb = jax.random.split(key, 3)

    x = jax.random.normal(kx, (B, D_in), dtype=jnp.float32)
    # Deterministic params mimicking nn.Linear's uniform(-1/sqrt(D_in), 1/sqrt(D_in))
    bound = 1.0 / (D_in ** 0.5)
    weight = jax.random.uniform(kw, (D_out, D_in), dtype=jnp.float32,
                                minval=-bound, maxval=bound)
    bias = jax.random.uniform(kb, (D_out,), dtype=jnp.float32,
                              minval=-bound, maxval=bound)

    # One-time parameter prep (hoisted out of the forward hot path).
    wt_p, b_p = prepare_single_layer_params(weight, bias)

    y = single_layer_forward(x, wt_p, b_p, d_out=D_out)
    y = jax.block_until_ready(y)

    y_ref = x @ weight.T + bias
    assert y.shape == (B, D_out)
    assert jnp.allclose(y, y_ref, atol=1e-5, rtol=1e-5)

    # --- Larger shapes (exercises the tiled / accumulating path) ------------
    B2, D_in2, D_out2 = 256, 1280, 640
    k2x, k2w, k2b = jax.random.split(jax.random.PRNGKey(1), 3)
    x2 = jax.random.normal(k2x, (B2, D_in2), dtype=jnp.float32)
    w2 = jax.random.normal(k2w, (D_out2, D_in2), dtype=jnp.float32) * 0.02
    b2 = jax.random.normal(k2b, (D_out2,), dtype=jnp.float32)

    wt2_p, b2_p = prepare_single_layer_params(w2, b2)
    y2 = jax.block_until_ready(single_layer_forward(x2, wt2_p, b2_p, d_out=D_out2))
    y2_ref = x2 @ w2.T + b2
    rel_err = jnp.max(jnp.abs(y2 - y2_ref)) / jnp.maximum(jnp.max(jnp.abs(y2_ref)), 1e-6)
    assert y2.shape == (B2, D_out2)
    assert rel_err < 1e-2

    print("KERNEL_OK")
</pallas_src>

<mosaic_0001>
module attributes {stable_mosaic.version = 11 : i64} {
  func.func @_linear_single_block_kernel(%arg0: memref<8x128xf32, #tpu.memory_space<vmem>>, %arg1: memref<128x128xf32, #tpu.memory_space<vmem>>, %arg2: memref<1x128xf32, #tpu.memory_space<vmem>>, %arg3: memref<8x128xf32, #tpu.memory_space<vmem>>) attributes {dimension_semantics = [], scalar_prefetch = 0 : i64, scratch_operands = 0 : i64, tpu.core_type = #tpu.core_type<tc>} {
    %c0 = arith.constant 0 : index
    %c0_0 = arith.constant 0 : index
    %0 = vector.load %arg0[%c0, %c0_0] : memref<8x128xf32, #tpu.memory_space<vmem>>, vector<8x128xf32>
    %c0_1 = arith.constant 0 : index
    %c0_2 = arith.constant 0 : index
    %1 = vector.load %arg1[%c0_1, %c0_2] : memref<128x128xf32, #tpu.memory_space<vmem>>, vector<128x128xf32>
    %cst = arith.constant dense<0.000000e+00> : vector<8x128xf32>
    %2 = tpu.matmul %0, %1, %cst {dimension_numbers = #tpu.dot_dimension_numbers<[1], [0], [0], [1], [0, 0, 1, 1], [], []>} : vector<8x128xf32>, vector<128x128xf32>, vector<8x128xf32> -> vector<8x128xf32>
    %c0_3 = arith.constant 0 : index
    %c0_4 = arith.constant 0 : index
    %3 = vector.load %arg2[%c0_3, %c0_4] : memref<1x128xf32, #tpu.memory_space<vmem>>, vector<1x128xf32>
    %4 = vector.broadcast %3 : vector<1x128xf32> to vector<8x128xf32>
    %5 = arith.addf %2, %4 : vector<8x128xf32>
    %c0_5 = arith.constant 0 : index
    %c0_6 = arith.constant 0 : index
    %6 = vector.load %arg3[%c0_5, %c0_6] : memref<8x128xf32, #tpu.memory_space<vmem>>, vector<8x128xf32>
    tpu.vector_store %arg3[%c0_5, %c0_6], %5 {strides = array<i32>} : memref<8x128xf32, #tpu.memory_space<vmem>>, vector<8x128xf32>,
    return
  }
}

</mosaic_0001>

<bundles_post_ra>
// kernel: single_layer_forward.1
= control target key start
LH: loop header
LB: loop body
LE: loop exit
PB: predicated region body
PF: predicated region fallthrough
CT: control target
= control target key end

     0   :  { %8 = vsyncpa [#allocation3], 0  ;;  %s328_s0 = inlined_call_operand.vmem [shape: f32[8,128], index: 0, kind: input, shape index: {}]   ;;  %s329_s1 = inlined_call_operand.hbm [shape: f32[128,128], index: 1, kind: input, shape index: {}]   ;;  %s330_s2 = inlined_call_operand.vmem [shape: f32[1,128], index: 2, kind: input, shape index: {}]   ;;  %s331_s3 = inlined_call_operand.hbm [shape: f32[8,128], index: 3, kind: output, shape index: {}]  }
   0x1   :  { %9 = vsyncpa [#allocation4], 0  ;;  %s271_s12 = smov [#allocation2]   ;;  %s223_s16 = scalar_lea.hbm %s329_s1, 2048 }
   0x2   :  { %s17_s13 = sshll.u32 %s271_s12, 4  ;;  %p224_p0 = scmp.ne.s32.totalorder %s329_s1, %s223_s16  ;;  %s18_s13 = int_to_ptr.vmem [resolvable:$true] %s17_s13 }
   0x3   :  { %p227_p1 = scmp.lt.u32.totalorder %s223_s16, %s329_s1 }
   0x5   :  { %p229_p2 = pnand %p227_p1, %p224_p0 }
   0x7   :  { %232 = shalt.err (!%p229_p2)
}
   0x8   :  { %s233_s21 = scalar_lea.vmem %s18_s13, 2048  ;;  %p238_p4 = scmp.lt.s32.totalorder %s18_s13, %s18_s13 }
   0x9   :  { %p234_p3 = scmp.ne.s32.totalorder %s18_s13, %s233_s21  ;;  %p239_p5 = scmp.lt.s32.totalorder %s233_s21, %s233_s21 }
   0xb   :  { %p240_p6 = por %p239_p5, %p238_p4 }
   0xd   :  { %p241_p7 = pnand %p240_p6, %p234_p3 }
   0xf   :  { %244 = shalt.err (!%p241_p7)
}
  0x10   :  { %s272_s22 = smov 128   ;;  %s273_s23 = smov 8  }
  0x11   :  { %23 = dma.hbm_to_vmem [thread:$0]  %s329_s1, 2048, %s18_s13, [#allocation3], %s272_s22, %s272_s22, %s273_s23  }
  0x12   :  { %267 = dma.done.wait [#allocation3], 2048  }
  0x13   :  { %268 = vsyncadd [#allocation3], 4294965248  ;;  %v274_v0 = vmov 0.0|0.0   ;;  %vm275_vm0 = vmmov 0   ;;  %v276_v1 = vmov 0.0   ;;  %v30_v2 = vld [vmem:[#allocation2] sm:$0xff] }
  0x14   :  { %192 = vmatprep.subr.bf16.mxu0 %v274_v0  ;;  %189 = vmatprep.mubr.msk.f32.mxu0 %vm275_vm0, %v276_v1  ;;  %v31_v3 = vld [vmem:[#allocation2 + $0x8] sm:$0xff]  ;;  %v32_v4 = vld [vmem:[#allocation2 + $0x10] sm:$0xff]  ;;  %v33_v6 = vld [vmem:[#allocation2 + $0x18] sm:$0xff]  ;;  %s277_s29 = smov [#allocation5]  }
  0x15   :  { %v193_v5 = vpack.c.bf16 %v31_v3, %v30_v2  ;;  %v196_v7 = vpack.c.bf16 %v33_v6, %v32_v4  ;;  %v34_v8 = vld [vmem:[#allocation2 + $0x20] sm:$0xff]  ;;  %v35_v9 = vld [vmem:[#allocation2 + $0x28] sm:$0xff]  ;;  %v36_v11 = vld [vmem:[#allocation2 + $0x30] sm:$0xff]  ;;  %s130_s30 = sshll.u32 %s277_s29, 4  ;;  %s131_s30 = int_to_ptr.vmem [resolvable:$true] %s130_s30 }
  0x16   :  { %v199_v10 = vpack.c.bf16 %v35_v9, %v34_v8  ;;  %v37_v12 = vld [vmem:[#allocation2 + $0x38] sm:$0xff]  ;;  %v38_v14 = vld [vmem:[#allocation2 + $0x40] sm:$0xff]  ;;  %v39_v15 = vld [vmem:[#allocation2 + $0x48] sm:$0xff]  ;;  %s245_s4 = scalar_lea.vmem %s131_s30, 128  ;;  %p250_p9 = scmp.lt.s32.totalorder %s131_s30, %s131_s30 }
  0x17   :  { %194 = vmatpush3.bf16.msra.mxu0 %v193_v5  ;;  %v202_v13 = vpack.c.bf16 %v37_v12, %v36_v11  ;;  %v205_v16 = vpack.c.bf16 %v39_v15, %v38_v14  ;;  %v40_v17 = vld [vmem:[#allocation2 + $0x50] sm:$0xff]  ;;  %v41_v18 = vld [vmem:[#allocation2 + $0x58] sm:$0xff]  ;;  %v42_v20 = vld [vmem:[#allocation2 + $0x60] sm:$0xff]  ;;  %p246_p8 = scmp.ne.s32.totalorder %s131_s30, %s245_s4  ;;  %p251_p10 = scmp.lt.s32.totalorder %s245_s4, %s245_s4 }
  0x18   :  { %195 = vmatprep.subr.bf16.mxu0 %v274_v0  ;;  %v208_v19 = vpack.c.bf16 %v41_v18, %v40_v17  ;;  %v43_v21 = vld [vmem:[#allocation2 + $0x68] sm:$0xff]  ;;  %v44_v23 = vld [vmem:[#allocation2 + $0x70] sm:$0xff]  ;;  %v45_v24 = vld [vmem:[#allocation2 + $0x78] sm:$0xff] }
  0x19   :  { %v211_v22 = vpack.c.bf16 %v43_v21, %v42_v20  ;;  %v214_v25 = vpack.c.bf16 %v45_v24, %v44_v23  ;;  %v29_v26 = vld [vmem:[%s328_s0] sm:$0xff]  ;;  %p252_p11 = por %p251_p10, %p250_p9 }
  0x1a   :  { %v139_v27 = vld [vmem:[%s330_s2] ss:$0 sm:$0xff] }
  0x1b   :  { %197 = vmatpush3.bf16.msra.mxu0 %v196_v7  ;;  %p253_p12 = pnand %p252_p11, %p246_p8 }
  0x1c   :  { %198 = vmatprep.subr.bf16.mxu0 %v274_v0 }
  0x1f   :  { %200 = vmatpush3.bf16.msra.mxu0 %v199_v10 }
  0x20   :  { %201 = vmatprep.subr.bf16.mxu0 %v274_v0 }
  0x23   :  { %203 = vmatpush3.bf16.msra.mxu0 %v202_v13 }
  0x24   :  { %204 = vmatprep.subr.bf16.mxu0 %v274_v0 }
  0x27   :  { %206 = vmatpush3.bf16.msra.mxu0 %v205_v16 }
  0x28   :  { %207 = vmatprep.subr.bf16.mxu0 %v274_v0 }
  0x2b   :  { %209 = vmatpush3.bf16.msra.mxu0 %v208_v19 }
  0x2c   :  { %210 = vmatprep.subr.bf16.mxu0 %v274_v0 }
  0x2f   :  { %212 = vmatpush3.bf16.msra.mxu0 %v211_v22 }
  0x30   :  { %213 = vmatprep.subr.bf16.mxu0 %v274_v0 }
  0x33   :  { %215 = vmatpush3.bf16.msra.mxu0 %v214_v25 }
  0x36   :  { %190 = vmatmul.mubr.f32.vlgmr.msra.gmra.mrb[0].mxu0 %v29_v26 }
 0x109   :  { %v119_v28 = vpop.f32.mrb[0].mxu0 }
 0x10a   :  { %v120_v29 = vadd.f32 %v139_v27, %v119_v28  ;;  %v191_v30 = vpop.f32.mrb[1].mxu0 }
 0x10c   :  { %123 = vst [vmem:[#allocation5] sm:$0xff] %v120_v29 }
 0x10d   :  { %256 = shalt.err (!%p253_p12)
}
 0x10e   :  { %s257_s6 = scalar_lea.hbm %s331_s3, 128 }
 0x10f   :  { %p258_p13 = scmp.ne.s32.totalorder %s331_s3, %s257_s6  ;;  %p261_p0 = scmp.lt.u32.totalorder %s257_s6, %s331_s3 }
 0x111   :  { %p263_p1 = pnand %p261_p0, %p258_p13 }
 0x113   :  { %266 = shalt.err (!%p263_p1)
}
 0x114   :  { %133 = dma.vmem_to_hbm [thread:$0]  %s131_s30, 128, %s331_s3, [#allocation4]  }
 0x115   :  { %269 = dma.done.wait [#allocation4], 128  }
 0x116   :  { %270 = vsyncadd [#allocation4], 4294967168 }
 0x117   :  { %137 = vsyncpa [#allocation3], 1 }
 0x118   :  { %138 = vsyncpa [#allocation4], 1 }

</bundles_post_ra>
